<compile_context>
chip_gen: v5e
topology: v5e:2x2
jax: 0.10.0
libtpu: 0.0.40
codegen_flags: <defaults>
</compile_context>

<pallas_src>
from typing import NamedTuple, Optional

import jax
import jax.numpy as jnp
import numpy as np
from jax import lax
from jax.experimental import pallas as pl
from jax.experimental.pallas import tpu as pltpu

_LANE = 128


# ----------------------------- small helpers --------------------------------

def _sublane_min(dtype):
    return {4: 8, 2: 16, 1: 32}.get(jnp.dtype(dtype).itemsize, 8)


def _round_up(x, m):
    return ((x + m - 1) // m) * m


def _device_kind():
    try:
        return jax.devices()[0].device_kind.lower()
    except Exception:
        return ""


def _vmem_capacity_bytes():
    try:
        return int(pltpu.get_tpu_info().vmem_capacity_bytes)
    except Exception:
        return 64 << 20  # conservative (v7x per-TensorCore size)


def _tile_targets():
    kind = _device_kind()
    if "v5" in kind:
        # v5e ridge (~240 FLOP/B) is already met at 512x512; default scoped VMEM is small.
        return 512, 512, 1024          # tm, tn, tk
    # v6e / v7x (and unknown): push toward the compute roofline.
    return 1024, 1024, 1024


def _choose_tile(dim, target, align):
    """Tile size (multiple of `align`) for a dim of logical size `dim`.
    If the aligned dim fits under `target`, use it whole.  Otherwise prefer a
    divisor tile in [target/2, target] (no extra padding); fall back to `target`
    itself, in which case the caller pads the dim up to a tile multiple."""
    dim_aligned = _round_up(max(dim, 1), align)
    target = max((target // align) * align, align)
    if dim_aligned <= target:
        return dim_aligned
    lo = max(align, ((target // 2) // align) * align)
    for cand in range(target, lo - 1, -align):
        if dim_aligned % cand == 0:
            return cand
    return target


def _shrink(tile, dim_pad, align):
    """Largest multiple of `align` <= tile//2 that divides dim_pad."""
    start = max(align, ((tile // 2) // align) * align)
    for cand in range(start, align - 1, -align):
        if dim_pad % cand == 0:
            return cand
    return align


def _plan_nk(in_features, out_features):
    _, tn_t, tk_t = _tile_targets()
    tk = _choose_tile(in_features, tk_t, _LANE)
    tn = _choose_tile(out_features, tn_t, _LANE)
    K_pad = _round_up(in_features, tk)
    N_pad = _round_up(out_features, tn)
    return tk, tn, K_pad, N_pad


# --------------------------- parameter preparation --------------------------

class LinearParams(NamedTuple):
    weight: jax.Array              # (N_pad, K_pad), PyTorch (out, in) layout, zero padded
    bias: Optional[jax.Array]      # (1, N_pad) or None
    in_features: int
    out_features: int


def prepare_linear(weight, bias=None) -> LinearParams:
    """Pad weight/bias ONCE (outside the hot path) to the tile multiples that
    linear_forward will use — avoids a full-weight HBM copy on every call."""
    out_features, in_features = weight.shape
    _, _, K_pad, N_pad = _plan_nk(in_features, out_features)
    w = weight
    if (N_pad, K_pad) != (out_features, in_features):
        w = jnp.pad(w, ((0, N_pad - out_features), (0, K_pad - in_features)))
    b2d = None
    if bias is not None:
        b2d = bias.reshape(1, out_features)
        if N_pad != out_features:
            b2d = jnp.pad(b2d, ((0, 0), (0, N_pad - out_features)))
    return LinearParams(w, b2d, in_features, out_features)


# --------------------------------- kernels ----------------------------------

def _make_kernel(has_bias, use_scratch, precision):
    # x(tm,tk) . W(tn,tk) contracting K on the last dim of both — MXU trans_b path.
    dims = (((1,), (1,)), ((), ()))

    def accumulate(acc, x_ref, w_ref, b_ref):
        k = pl.program_id(2)
        partial = lax.dot_general(
            x_ref[...], w_ref[...], dims,
            preferred_element_type=jnp.float32, precision=precision)

        @pl.when(k == 0)
        def _():
            # First K step writes directly (no zero-init store/reload); bias folded in.
            if has_bias:
                acc[...] = partial + b_ref[...].astype(jnp.float32)
            else:
                acc[...] = partial

        @pl.when(k > 0)
        def _():
            acc[...] += partial

    if use_scratch:
        if has_bias:
            def kernel(x_ref, w_ref, b_ref, o_ref, acc_ref):
                accumulate(acc_ref, x_ref, w_ref, b_ref)

                @pl.when(pl.program_id(2) == pl.num_programs(2) - 1)
                def _():
                    o_ref[...] = acc_ref[...].astype(o_ref.dtype)
        else:
            def kernel(x_ref, w_ref, o_ref, acc_ref):
                accumulate(acc_ref, x_ref, w_ref, None)

                @pl.when(pl.program_id(2) == pl.num_programs(2) - 1)
                def _():
                    o_ref[...] = acc_ref[...].astype(o_ref.dtype)
    else:
        # f32 output: accumulate straight into the (resident) output block.
        if has_bias:
            def kernel(x_ref, w_ref, b_ref, o_ref):
                accumulate(o_ref, x_ref, w_ref, b_ref)
        else:
            def kernel(x_ref, w_ref, o_ref):
                accumulate(o_ref, x_ref, w_ref, None)
    return kernel


# --------------------------------- wrapper ----------------------------------

def linear_forward(x, weight, bias=None, *, precision=None):
    """
    x:      (*, in_features)
    weight: LinearParams (preferred, from prepare_linear) OR raw (out_features, in_features)
    bias:   (out_features,) or None (ignored if weight is a LinearParams)
    returns (*, out_features), dtype = x.dtype
    """
    if isinstance(weight, LinearParams):
        params = weight
    else:
        params = prepare_linear(weight, bias)

    in_features, out_features = params.in_features, params.out_features
    w, b2d = params.weight, params.bias
    has_bias = b2d is not None
    assert x.shape[-1] == in_features

    tk, tn, K_pad, N_pad = _plan_nk(in_features, out_features)
    assert w.shape == (N_pad, K_pad), "weight was padded with a different plan"

    lead_shape = x.shape[:-1]
    M = int(np.prod(lead_shape)) if lead_shape else 1
    x2d = x.reshape(M, in_features)

    out_dtype = x.dtype
    x_itemsize = jnp.dtype(x.dtype).itemsize
    w_itemsize = jnp.dtype(w.dtype).itemsize
    out_itemsize = jnp.dtype(out_dtype).itemsize
    sub = _sublane_min(x.dtype)
    use_scratch = out_dtype != jnp.float32

    tm_t, _, _ = _tile_targets()
    tm = _choose_tile(M, tm_t, sub)
    M_pad = _round_up(max(M, 1), tm)

    # v7x has 2 TensorCores per chip: make sure a "parallel" axis has >= 2 blocks.
    if "v7" in _device_kind() and M_pad // tm == 1 and N_pad // tn == 1 and tn > _LANE:
        tn = _shrink(tn, N_pad, _LANE)

    # --- VMEM budgeting (v7x: 64 MiB physical per TC; v5e/v6e: 128 MiB) -----
    vmem_cap = _vmem_capacity_bytes()
    budget = min((vmem_cap * 3) // 4, 96 << 20)

    def pipeline_bytes(tm_, tn_, tk_):
        b = 2 * (tm_ * tk_ * x_itemsize + tn_ * tk_ * w_itemsize)   # double-buffered inputs
        b += 2 * tm_ * tn_ * out_itemsize                           # double-buffered output
        if has_bias:
            b += 2 * tn_ * jnp.dtype(b2d.dtype).itemsize
        if use_scratch:
            b += tm_ * tn_ * 4                                      # f32 accumulator
        return b

    guard = 0
    while pipeline_bytes(tm, tn, tk) > budget and guard < 16:
        guard += 1
        if tk > _LANE:
            tk = _shrink(tk, K_pad, _LANE)          # cut tk before tm/tn (keeps intensity)
        elif tn > _LANE:
            tn = _shrink(tn, N_pad, _LANE)
        elif tm > sub:
            tm = _shrink(tm, M_pad, sub)
        else:
            break
    vmem_limit = int(min(vmem_cap, max(pipeline_bytes(tm, tn, tk) + (16 << 20), 32 << 20)))

    # --- pad activations (zero padding is exact for an affine map) ----------
    if (M_pad, K_pad) != (M, in_features):
        x2d = jnp.pad(x2d, ((0, M_pad - M), (0, K_pad - in_features)))

    grid = (M_pad // tm, N_pad // tn, K_pad // tk)

    x_spec = pl.BlockSpec((tm, tk), lambda i, j, k: (i, k))
    w_spec = pl.BlockSpec((tn, tk), lambda i, j, k: (j, k))
    o_spec = pl.BlockSpec((tm, tn), lambda i, j, k: (i, j))
    in_specs = [x_spec, w_spec]
    operands = [x2d, w]
    if has_bias:
        in_specs.append(pl.BlockSpec((1, tn), lambda i, j, k: (0, j)))
        operands.append(b2d)
    scratch_shapes = [pltpu.VMEM((tm, tn), jnp.float32)] if use_scratch else []

    cost = pl.CostEstimate(
        flops=2 * M_pad * K_pad * N_pad,
        transcendentals=0,
        bytes_accessed=(
            M_pad * K_pad * x_itemsize
            + N_pad * K_pad * w_itemsize
            + M_pad * N_pad * out_itemsize
            + (N_pad * jnp.dtype(b2d.dtype).itemsize if has_bias else 0)
        ),
    )

    out2d = pl.pallas_call(
        _make_kernel(has_bias, use_scratch, precision),
        out_shape=jax.ShapeDtypeStruct((M_pad, N_pad), out_dtype),
        grid_spec=pltpu.PrefetchScalarGridSpec(
            num_scalar_prefetch=0,
            grid=grid,
            in_specs=in_specs,
            out_specs=o_spec,
            scratch_shapes=scratch_shapes,
        ),
        compiler_params=pltpu.CompilerParams(
            dimension_semantics=("parallel", "parallel", "arbitrary"),
            vmem_limit_bytes=vmem_limit,
        ),
        cost_estimate=cost,
    )(*operands)

    out2d = out2d[:M, :out_features]
    return out2d.reshape(*lead_shape, out_features)


# --------------------------- init (matches module) ---------------------------

def init_linear_params(key, in_features, out_features, bias=True, dtype=jnp.float32):
    """Deterministic init matching the PyTorch module: scale * (2*U[0,1) - 1)."""
    scale = 1.0 / np.sqrt(in_features)
    kw, kb = jax.random.split(key)
    w = scale * (2.0 * jax.random.uniform(kw, (out_features, in_features), dtype=dtype) - 1.0)
    b = None
    if bias:
        b = scale * (2.0 * jax.random.uniform(kb, (out_features,), dtype=dtype) - 1.0)
    return w, b


# ----------------------------------- demo -----------------------------------

if __name__ == "__main__":
    key = jax.random.PRNGKey(0)
    k_x, k_p = jax.random.split(key)

    batch, seq, in_features, out_features = 2, 8, 32, 64
    x = jax.random.normal(k_x, (batch, seq, in_features), dtype=jnp.float32)
    weight, bias = init_linear_params(k_p, in_features, out_features, bias=True)

    # Pre-pad parameters once (hot-path calls then do zero per-call weight padding).
    params = prepare_linear(weight, bias)
    params_nb = prepare_linear(weight, None)

    # With bias (f32 -> accumulate directly into output block).
    y = jax.block_until_ready(linear_forward(x, params))
    y_ref = jnp.einsum("...i,oi->...o", x, weight) + bias
    np.testing.assert_allclose(np.asarray(y), np.asarray(y_ref), rtol=1e-5, atol=1e-5)
    assert y.shape == (batch, seq, out_features)

    # Without bias.
    y_nb = jax.block_until_ready(linear_forward(x, params_nb))
    y_nb_ref = jnp.einsum("...i,oi->...o", x, weight)
    np.testing.assert_allclose(np.asarray(y_nb), np.asarray(y_nb_ref), rtol=1e-5, atol=1e-5)

    # Raw (non-prepared) path still works.
    y_raw = jax.block_until_ready(linear_forward(x, weight, bias))
    np.testing.assert_allclose(np.asarray(y_raw), np.asarray(y_ref), rtol=1e-5, atol=1e-5)

    # bf16 path (exercises the f32 scratch-accumulator kernel).
    x_bf = x.astype(jnp.bfloat16)
    w_bf, b_bf = weight.astype(jnp.bfloat16), bias.astype(jnp.bfloat16)
    y_bf = jax.block_until_ready(linear_forward(x_bf, prepare_linear(w_bf, b_bf)))
    y_bf_ref = (jnp.einsum("...i,oi->...o",
                           x_bf.astype(jnp.float32), w_bf.astype(jnp.float32))
                + b_bf.astype(jnp.float32))
    np.testing.assert_allclose(np.asarray(y_bf, dtype=np.float32), np.asarray(y_bf_ref),
                               rtol=5e-2, atol=5e-2)

    print("KERNEL_OK")
</pallas_src>

<mosaic_0001>
module attributes {stable_mosaic.version = 11 : i64} {
  func.func @kernel(%arg0: i32, %arg1: i32, %arg2: i32, %arg3: memref<16x128xf32, #tpu.memory_space<vmem>>, %arg4: memref<128x128xf32, #tpu.memory_space<vmem>>, %arg5: memref<1x128xf32, #tpu.memory_space<vmem>>, %arg6: memref<16x128xf32, #tpu.memory_space<vmem>>) attributes {dimension_semantics = [#tpu.dimension_semantics<parallel>, #tpu.dimension_semantics<parallel>, #tpu.dimension_semantics<arbitrary>], iteration_bounds = array<i64: 1, 1, 1>, scalar_prefetch = 0 : i64, scratch_operands = 0 : i64, tpu.core_type = #tpu.core_type<tc>, window_params = [{transform_indices = @transform_0, window_bounds = array<i64: 16, 128>}, {transform_indices = @transform_1, window_bounds = array<i64: 128, 128>}, {transform_indices = @transform_2, window_bounds = array<i64: 1, 128>}, {transform_indices = @transform_3, window_bounds = array<i64: 16, 128>}]} {
    %c0 = arith.constant 0 : index
    %c0_0 = arith.constant 0 : index
    %0 = vector.load %arg3[%c0, %c0_0] : memref<16x128xf32, #tpu.memory_space<vmem>>, vector<16x128xf32>
    %c0_1 = arith.constant 0 : index
    %c0_2 = arith.constant 0 : index
    %1 = vector.load %arg4[%c0_1, %c0_2] : memref<128x128xf32, #tpu.memory_space<vmem>>, vector<128x128xf32>
    %cst = arith.constant dense<0.000000e+00> : vector<16x128xf32>
    %2 = tpu.matmul %0, %1, %cst {dimension_numbers = #tpu.dot_dimension_numbers<[1], [1], [0], [0], [0, 0, 1, 0], [], []>} : vector<16x128xf32>, vector<128x128xf32>, vector<16x128xf32> -> vector<16x128xf32>
    %c0_i32 = arith.constant 0 : i32
    %3 = arith.cmpi eq, %arg2, %c0_i32 : i32
    %4 = arith.extui %3 : i1 to i32
    %c0_i32_3 = arith.constant 0 : i32
    %5 = arith.cmpi ne, %4, %c0_i32_3 : i32
    scf.if %5 {
      %c0_6 = arith.constant 0 : index
      %c0_7 = arith.constant 0 : index
      %9 = vector.load %arg5[%c0_6, %c0_7] : memref<1x128xf32, #tpu.memory_space<vmem>>, vector<1x128xf32>
      %10 = vector.broadcast %9 : vector<1x128xf32> to vector<16x128xf32>
      %11 = arith.addf %2, %10 : vector<16x128xf32>
      %c0_8 = arith.constant 0 : index
      %c0_9 = arith.constant 0 : index
      %12 = vector.load %arg6[%c0_8, %c0_9] : memref<16x128xf32, #tpu.memory_space<vmem>>, vector<16x128xf32>
      tpu.vector_store %arg6[%c0_8, %c0_9], %11 {strides = array<i32>} : memref<16x128xf32, #tpu.memory_space<vmem>>, vector<16x128xf32>,
    } else {
    }
    %c0_i32_4 = arith.constant 0 : i32
    %6 = arith.cmpi sgt, %arg2, %c0_i32_4 : i32
    %7 = arith.extui %6 : i1 to i32
    %c0_i32_5 = arith.constant 0 : i32
    %8 = arith.cmpi ne, %7, %c0_i32_5 : i32
    scf.if %8 {
      %c0_6 = arith.constant 0 : index
      %c0_7 = arith.constant 0 : index
      %9 = vector.load %arg6[%c0_6, %c0_7] : memref<16x128xf32, #tpu.memory_space<vmem>>, vector<16x128xf32>
      %10 = arith.addf %9, %2 : vector<16x128xf32>
      %c0_8 = arith.constant 0 : index
      %c0_9 = arith.constant 0 : index
      %11 = vector.load %arg6[%c0_8, %c0_9] : memref<16x128xf32, #tpu.memory_space<vmem>>, vector<16x128xf32>
      tpu.vector_store %arg6[%c0_8, %c0_9], %10 {strides = array<i32>} : memref<16x128xf32, #tpu.memory_space<vmem>>, vector<16x128xf32>,
    } else {
    }
    return
  }
  func.func @transform_0(%arg0: i32, %arg1: i32, %arg2: i32) -> (i32, i32) {
    %c0_i32 = arith.constant 0 : i32
    return %arg0, %arg2 : i32, i32
  }
  func.func @transform_1(%arg0: i32, %arg1: i32, %arg2: i32) -> (i32, i32) {
    %c0_i32 = arith.constant 0 : i32
    return %arg1, %arg2 : i32, i32
  }
  func.func @transform_2(%arg0: i32, %arg1: i32, %arg2: i32) -> (i32, i32) {
    %c0_i32 = arith.constant 0 : i32
    %c0_i32_0 = arith.constant 0 : i32
    return %c0_i32, %arg1 : i32, i32
  }
  func.func @transform_3(%arg0: i32, %arg1: i32, %arg2: i32) -> (i32, i32) {
    %c0_i32 = arith.constant 0 : i32
    return %arg0, %arg1 : i32, i32
  }
}

</mosaic_0001>

<bundles_post_ra>
// kernel: tpu_custom_call.1
= control target key start
LH: loop header
LB: loop body
LE: loop exit
PB: predicated region body
PF: predicated region fallthrough
CT: control target
= control target key end

     0   :  { %8 = vsyncpa [#allocation3], 0  ;;  %s276_s0 = inlined_call_operand.hbm [shape: f32[16,128], index: 0, kind: input, shape index: {}]   ;;  %s277_s1 = inlined_call_operand.hbm [shape: f32[128,128], index: 1, kind: input, shape index: {}]   ;;  %s278_s2 = inlined_call_operand.vmem [shape: f32[1,128], index: 2, kind: input, shape index: {}]   ;;  %s279_s3 = inlined_call_operand.hbm [shape: f32[16,128], index: 3, kind: output, shape index: {}]  }
   0x1   :  { %9 = vsyncpa [#allocation6], 0 }
   0x2   :  { %10 = vsyncpa [#allocation4], 0  ;;  %s15_s14 = sshll.u32 %s276_s0, 4  ;;  %s230_s15 = smov [#allocation2]   ;;  %s16_s14 = int_to_ptr.hbm [resolvable:$true] %s15_s14 }
   0x3   :  { %s17_s16 = sshll.u32 %s230_s15, 4  ;;  %s28_s19 = sshll.u32 %s277_s1, 4  ;;  %s18_s16 = int_to_ptr.vmem [resolvable:$true] %s17_s16  ;;  %s29_s19 = int_to_ptr.hbm [resolvable:$true] %s28_s19 }
   0x4   :  { %s231_s20 = smov 128   ;;  %s232_s21 = smov 8  }
   0x5   :  { %23 = dma.hbm_to_vmem [thread:$0]  %s16_s14, 256, %s18_s16, [#allocation3], %s231_s20, %s231_s20, %s232_s21  }
   0x6   :  { %s233_s22 = smov [#allocation5]  }
   0x7   :  { %s30_s23 = sshll.u32 %s233_s22, 4  ;;  %s31_s23 = int_to_ptr.vmem [resolvable:$true] %s30_s23 }
   0x8   :  { %36 = dma.hbm_to_vmem [thread:$0]  %s29_s19, 2048, %s31_s23, [#allocation6], %s231_s20, %s231_s20, %s232_s21  }
   0x9   :  { %224 = dma.done.wait [#allocation3], 256  }
   0xa   :  { %225 = vsyncadd [#allocation3], 4294967040 }
   0xb   :  { %226 = dma.done.wait [#allocation6], 2048  }
   0xc   :  { %227 = vsyncadd [#allocation6], 4294965248  ;;  %v64_v0 = vld [vmem:[#allocation5 + $0x78] sm:$0xff]  ;;  %v63_v1 = vld [vmem:[#allocation5 + $0x70] sm:$0xff]  ;;  %s234_s24 = smov [#allocation7]   ;;  %s116_s28 = sshll.u32 %s279_s3, 4  ;;  %s117_s28 = int_to_ptr.hbm [resolvable:$true] %s116_s28 }
   0xd   :  { %65 = vmatpush.xpose.msra.mxu0 %v64_v0  ;;  %130 = vmatpush.xpose.msra.mxu1 %v64_v0  ;;  %v62_v2 = vld [vmem:[#allocation5 + $0x68] sm:$0xff]  ;;  %v61_v3 = vld [vmem:[#allocation5 + $0x60] sm:$0xff]  ;;  %v60_v4 = vld [vmem:[#allocation5 + $0x58] sm:$0xff]  ;;  %s114_s25 = sshll.u32 %s234_s24, 4  ;;  %s115_s25 = int_to_ptr.vmem [resolvable:$true] %s114_s25 }
   0xe   :  { %v59_v5 = vld [vmem:[#allocation5 + $0x50] sm:$0xff]  ;;  %v58_v6 = vld [vmem:[#allocation5 + $0x48] sm:$0xff]  ;;  %v57_v7 = vld [vmem:[#allocation5 + $0x40] sm:$0xff] }
   0xf   :  { %v56_v8 = vld [vmem:[#allocation5 + $0x38] sm:$0xff]  ;;  %v55_v9 = vld [vmem:[#allocation5 + $0x30] sm:$0xff]  ;;  %v54_v10 = vld [vmem:[#allocation5 + $0x28] sm:$0xff] }
  0x10   :  { %v53_v11 = vld [vmem:[#allocation5 + $0x20] sm:$0xff]  ;;  %v52_v12 = vld [vmem:[#allocation5 + $0x18] sm:$0xff]  ;;  %v51_v13 = vld [vmem:[#allocation5 + $0x10] sm:$0xff] }
  0x11   :  { %66 = vmatpush.xpose.msra.mxu0 %v63_v1  ;;  %131 = vmatpush.xpose.msra.mxu1 %v63_v1  ;;  %v50_v14 = vld [vmem:[#allocation5 + $0x8] sm:$0xff]  ;;  %v49_v15 = vld [vmem:[#allocation5] sm:$0xff]  ;;  %v47_v16 = vld [vmem:[#allocation2] sm:$0xff] }
  0x12   :  { %v48_v17 = vld [vmem:[#allocation2 + $0x8] sm:$0xff]  ;;  %v151_v18 = vld [vmem:[%s278_s2] ss:$0 sm:$0xff] }
  0x15   :  { %67 = vmatpush.xpose.msra.mxu0 %v62_v2  ;;  %132 = vmatpush.xpose.msra.mxu1 %v62_v2 }
  0x19   :  { %68 = vmatpush.xpose.msra.mxu0 %v61_v3  ;;  %133 = vmatpush.xpose.msra.mxu1 %v61_v3 }
  0x1d   :  { %69 = vmatpush.xpose.msra.mxu0 %v60_v4  ;;  %134 = vmatpush.xpose.msra.mxu1 %v60_v4 }
  0x21   :  { %70 = vmatpush.xpose.msra.mxu0 %v59_v5  ;;  %135 = vmatpush.xpose.msra.mxu1 %v59_v5 }
  0x25   :  { %71 = vmatpush.xpose.msra.mxu0 %v58_v6  ;;  %136 = vmatpush.xpose.msra.mxu1 %v58_v6 }
  0x29   :  { %72 = vmatpush.xpose.msra.mxu0 %v57_v7  ;;  %137 = vmatpush.xpose.msra.mxu1 %v57_v7 }
  0x2d   :  { %73 = vmatpush.xpose.msra.mxu0 %v56_v8  ;;  %138 = vmatpush.xpose.msra.mxu1 %v56_v8 }
  0x31   :  { %74 = vmatpush.xpose.msra.mxu0 %v55_v9  ;;  %139 = vmatpush.xpose.msra.mxu1 %v55_v9 }
  0x35   :  { %75 = vmatpush.xpose.msra.mxu0 %v54_v10  ;;  %140 = vmatpush.xpose.msra.mxu1 %v54_v10 }
  0x39   :  { %76 = vmatpush.xpose.msra.mxu0 %v53_v11  ;;  %141 = vmatpush.xpose.msra.mxu1 %v53_v11 }
  0x3d   :  { %77 = vmatpush.xpose.msra.mxu0 %v52_v12  ;;  %142 = vmatpush.xpose.msra.mxu1 %v52_v12 }
  0x41   :  { %78 = vmatpush.xpose.msra.mxu0 %v51_v13  ;;  %143 = vmatpush.xpose.msra.mxu1 %v51_v13 }
  0x45   :  { %79 = vmatpush.xpose.msra.mxu0 %v50_v14  ;;  %144 = vmatpush.xpose.msra.mxu1 %v50_v14 }
  0x49   :  { %80 = vmatpush.xpose.msra.mxu0 %v49_v15  ;;  %145 = vmatpush.xpose.msra.mxu1 %v49_v15 }
  0x4c   :  { %81 = vmatmul.f32.vlgmr.msra.gmra.mxu0 %v47_v16  ;;  %84 = vmatmul.f32.vlgmr.msra.gmra.mxu1 %v48_v17 }
  0xc9   :  { %v82_v19 = vpop.f32.mrf.mxu0  ;;  %v85_v20 = vpop.f32.mrf.mxu1 }
  0xca   :  { %v96_v21 = vadd.f32 %v151_v18, %v82_v19  ;;  %v97_v22 = vadd.f32 %v151_v18, %v85_v20 }
  0xcc   :  { %98 = vst [vmem:[#allocation7] sm:$0xff] %v96_v21 }
  0xcd   :  { %99 = vst [vmem:[#allocation7 + $0x8] sm:$0xff] %v97_v22 }
  0xce   :  { %122 = dma.vmem_to_hbm [thread:$0]  %s115_s25, 256, %s117_s28, [#allocation4], %s231_s20, %s231_s20, %s232_s21  }
  0xcf   :  { %228 = dma.done.wait [#allocation4], 256  }
  0xd0   :  { %229 = vsyncadd [#allocation4], 4294967040 }
  0xd1   :  { %127 = vsyncpa [#allocation3], 1 }
  0xd2   :  { %128 = vsyncpa [#allocation6], 1 }
  0xd3   :  { %129 = vsyncpa [#allocation4], 1 }

</bundles_post_ra>
